<compile_context>
chip_gen: v7x
topology: tpu7x:2x2x1
jax: 0.10.0
libtpu: 0.0.40
codegen_flags: <defaults>
</compile_context>

<pallas_src>
import functools

import jax
import jax.numpy as jnp
from jax.experimental import pallas as pl
from jax.experimental.pallas import tpu as pltpu


def _round_up(n, m):
    return ((n + m - 1) // m) * m


def _dropout(h, p, training, seed_u32, row_off_u32, layer):
    """Inverted dropout (same semantics as torch.nn.Dropout in train mode).

    Mask bits come from a cheap counter-based hash of (seed, layer, global_row,
    col), so masks are independent of the batch tiling and differ per tile.
    Keep decision is an integer-threshold compare on the raw 32-bit hash.
    """
    if (not training) or p <= 0.0:
        return h
    rows = jax.lax.broadcasted_iota(jnp.uint32, h.shape, 0) + row_off_u32
    cols = jax.lax.broadcasted_iota(jnp.uint32, h.shape, 1)
    bits = (rows * jnp.uint32(0x9E3779B1)) ^ (cols * jnp.uint32(0x85EBCA77))
    bits = bits ^ (seed_u32 + jnp.uint32(layer) * jnp.uint32(0x27D4EB2F))
    # lowbias32-style finalizer
    bits = bits ^ (bits >> 16)
    bits = bits * jnp.uint32(0x7FEB352D)
    bits = bits ^ (bits >> 15)
    bits = bits * jnp.uint32(0x846CA68B)
    bits = bits ^ (bits >> 16)
    thresh = jnp.uint32(min(int(p * 4294967296.0), 4294967295))
    keep = bits >= thresh                      # P(keep) = 1 - p (to within 2^-32)
    scale = jnp.float32(1.0 / (1.0 - p))
    return jnp.where(keep, h * scale, jnp.float32(0.0))


def _mlp_kernel(seed_ref, x_ref, w1_ref, b1_ref, w2_ref, b2_ref, w3_ref, b3_ref,
                o_ref, *, p1, p2, training, tb):
    seed_u32 = seed_ref[0].astype(jnp.uint32)
    row_off = (pl.program_id(0) * tb).astype(jnp.uint32)

    x = x_ref[...]                                                  # bf16 (tb, NI)

    h = jnp.dot(x, w1_ref[...], preferred_element_type=jnp.float32) + b1_ref[...]
    h = jnp.maximum(h, 0.0)
    h = _dropout(h, p1, training, seed_u32, row_off, layer=1)

    h = jnp.dot(h.astype(jnp.bfloat16), w2_ref[...],
                preferred_element_type=jnp.float32) + b2_ref[...]
    h = jnp.maximum(h, 0.0)
    h = _dropout(h, p2, training, seed_u32, row_off, layer=2)

    h = jnp.dot(h.astype(jnp.bfloat16), w3_ref[...],
                preferred_element_type=jnp.float32) + b3_ref[...]
    o_ref[...] = jnp.maximum(h, 0.0)


def net_forward(x, params, seed, *, dropout1, dropout2, training=True, tb=None):
    """Full MLP forward as a single batch-tiled Pallas kernel."""
    w1, b1, w2, b2, w3, b3 = params
    B = x.shape[0]
    num_inputs = w1.shape[0]
    num_outputs = w3.shape[1]

    xf = x.reshape(B, -1)
    assert xf.shape[1] == num_inputs

    # Pad every feature dim to a multiple of 128 (lane-dense vregs / full MXU
    # lanes / unmasked stores). Zero padding does not change the math.
    ni = _round_up(num_inputs, 128)
    nh1 = _round_up(w1.shape[1], 128)
    nh2 = _round_up(w2.shape[1], 128)
    no = _round_up(num_outputs, 128)

    def pad2(a, r, c):
        return jnp.pad(a, ((0, r - a.shape[0]), (0, c - a.shape[1])))

    # Batch tile: multiple of 8 sublanes, MXU-friendly, capped so double-buffered
    # x/out tiles + resident weights stay far under v5e's 16 MiB scoped VMEM.
    if tb is None:
        tb = min(256, _round_up(max(B, 8), 8))
    bp = _round_up(B, tb)
    nb = bp // tb

    xp = pad2(xf.astype(jnp.bfloat16), bp, ni)
    w1p = pad2(w1.astype(jnp.bfloat16), ni, nh1)
    w2p = pad2(w2.astype(jnp.bfloat16), nh1, nh2)
    w3p = pad2(w3.astype(jnp.bfloat16), nh2, no)
    b1p = pad2(b1.reshape(1, -1).astype(jnp.float32), 1, nh1)
    b2p = pad2(b2.reshape(1, -1).astype(jnp.float32), 1, nh2)
    b3p = pad2(b3.reshape(1, -1).astype(jnp.float32), 1, no)

    seed_arr = jnp.asarray([seed], dtype=jnp.int32)

    kernel = functools.partial(
        _mlp_kernel, p1=float(dropout1), p2=float(dropout2),
        training=bool(training), tb=tb)

    grid_spec = pltpu.PrefetchScalarGridSpec(
        num_scalar_prefetch=1,
        grid=(nb,),
        in_specs=[
            pl.BlockSpec((tb, ni), lambda i, s: (i, 0)),    # x: tiled over batch
            pl.BlockSpec((ni, nh1), lambda i, s: (0, 0)),   # weights/biases stay
            pl.BlockSpec((1, nh1), lambda i, s: (0, 0)),    # resident in VMEM
            pl.BlockSpec((nh1, nh2), lambda i, s: (0, 0)),
            pl.BlockSpec((1, nh2), lambda i, s: (0, 0)),
            pl.BlockSpec((nh2, no), lambda i, s: (0, 0)),
            pl.BlockSpec((1, no), lambda i, s: (0, 0)),
        ],
        out_specs=pl.BlockSpec((tb, no), lambda i, s: (i, 0)),
    )

    out = pl.pallas_call(
        kernel,
        out_shape=jax.ShapeDtypeStruct((bp, no), jnp.float32),
        grid_spec=grid_spec,
        compiler_params=pltpu.CompilerParams(
            dimension_semantics=("parallel",),
            vmem_limit_bytes=32 * 1024 * 1024),
    )(seed_arr, xp, w1p, b1p, w2p, b2p, w3p, b3p)

    return out[:B, :num_outputs]


def init_linear(key, fan_in, fan_out):
    """Matches nn.Linear's default U(-1/sqrt(fan_in), 1/sqrt(fan_in)) init."""
    kw, kb = jax.random.split(key)
    bound = 1.0 / float(fan_in) ** 0.5
    w = jax.random.uniform(kw, (fan_in, fan_out), jnp.float32, -bound, bound)
    b = jax.random.uniform(kb, (fan_out,), jnp.float32, -bound, bound)
    return w, b


if __name__ == "__main__":
    key = jax.random.PRNGKey(0)
    k1, k2, k3, kx = jax.random.split(key, 4)

    # Small shapes consistent with the module: NCHW input flattened to num_inputs.
    B, C, H, W = 2, 4, 16, 16
    num_inputs = C * H * W                  # 1024
    num_hiddens1, num_hiddens2 = 256, 128
    num_outputs = 64
    dropout1, dropout2 = 0.2, 0.5

    w1, b1 = init_linear(k1, num_inputs, num_hiddens1)
    w2, b2 = init_linear(k2, num_hiddens1, num_hiddens2)
    w3, b3 = init_linear(k3, num_hiddens2, num_outputs)
    params = (w1, b1, w2, b2, w3, b3)

    x = jax.random.normal(kx, (B, C, H, W), jnp.float32)

    # Training-mode pass (exercises the in-kernel dropout path).
    out = net_forward(x, params, seed=0,
                      dropout1=dropout1, dropout2=dropout2, training=True)
    out = jax.block_until_ready(out)
    assert out.shape == (B, num_outputs)
    assert bool(jnp.all(out >= 0.0))        # final ReLU
    assert bool(jnp.all(jnp.isfinite(out)))

    # Eval-mode pass is deterministic: compare against a pure-JAX reference
    # that uses the same bf16-matmul / f32-accumulate recipe.
    out_eval = net_forward(x, params, seed=0,
                           dropout1=dropout1, dropout2=dropout2, training=False)
    out_eval = jax.block_until_ready(out_eval)

    def ref_eval(x, params):
        w1, b1, w2, b2, w3, b3 = params
        h = x.reshape(x.shape[0], -1).astype(jnp.bfloat16)
        h = jnp.maximum(jnp.dot(h, w1.astype(jnp.bfloat16),
                                preferred_element_type=jnp.float32) + b1, 0.0)
        h = jnp.maximum(jnp.dot(h.astype(jnp.bfloat16), w2.astype(jnp.bfloat16),
                                preferred_element_type=jnp.float32) + b2, 0.0)
        h = jnp.maximum(jnp.dot(h.astype(jnp.bfloat16), w3.astype(jnp.bfloat16),
                                preferred_element_type=jnp.float32) + b3, 0.0)
        return h

    ref = ref_eval(x, params)
    assert out_eval.shape == ref.shape
    assert bool(jnp.allclose(out_eval, ref, rtol=2e-2, atol=2e-2))

    print("KERNEL_OK")
</pallas_src>

<mosaic_0001>
module attributes {stable_mosaic.version = 11 : i64} {
  func.func @_mlp_kernel(%arg0: i32, %arg1: memref<1xi32, #tpu.memory_space<smem>>, %arg2: memref<8x1024xbf16, #tpu.memory_space<vmem>>, %arg3: memref<1024x256xbf16, #tpu.memory_space<vmem>>, %arg4: memref<1x256xf32, #tpu.memory_space<vmem>>, %arg5: memref<256x128xbf16, #tpu.memory_space<vmem>>, %arg6: memref<1x128xf32, #tpu.memory_space<vmem>>, %arg7: memref<128x128xbf16, #tpu.memory_space<vmem>>, %arg8: memref<1x128xf32, #tpu.memory_space<vmem>>, %arg9: memref<8x128xf32, #tpu.memory_space<vmem>>) attributes {dimension_semantics = [#tpu.dimension_semantics<parallel>], iteration_bounds = array<i64: 1>, scalar_prefetch = 1 : i64, scratch_operands = 0 : i64, tpu.core_type = #tpu.core_type<tc>, window_params = [{transform_indices = @transform_0, window_bounds = array<i64: 8, 1024>}, {pipeline_mode = #tpu.pipeline_mode<synchronous>, transform_indices = @transform_1, window_bounds = array<i64: 1024, 256>}, {pipeline_mode = #tpu.pipeline_mode<synchronous>, transform_indices = @transform_2, window_bounds = array<i64: 1, 256>}, {pipeline_mode = #tpu.pipeline_mode<synchronous>, transform_indices = @transform_3, window_bounds = array<i64: 256, 128>}, {pipeline_mode = #tpu.pipeline_mode<synchronous>, transform_indices = @transform_4, window_bounds = array<i64: 1, 128>}, {pipeline_mode = #tpu.pipeline_mode<synchronous>, transform_indices = @transform_5, window_bounds = array<i64: 128, 128>}, {pipeline_mode = #tpu.pipeline_mode<synchronous>, transform_indices = @transform_6, window_bounds = array<i64: 1, 128>}, {transform_indices = @transform_7, window_bounds = array<i64: 8, 128>}]} {
    %c0 = arith.constant 0 : index
    %0 = memref.load %arg1[%c0] : memref<1xi32, #tpu.memory_space<smem>>
    %c8_i32 = arith.constant 8 : i32
    %1 = arith.muli %arg0, %c8_i32 : i32
    %c0_0 = arith.constant 0 : index
    %c0_1 = arith.constant 0 : index
    %2 = vector.load %arg2[%c0_0, %c0_1] : memref<8x1024xbf16, #tpu.memory_space<vmem>>, vector<8x1024xbf16>
    %c0_2 = arith.constant 0 : index
    %c0_3 = arith.constant 0 : index
    %3 = vector.load %arg3[%c0_2, %c0_3] : memref<1024x256xbf16, #tpu.memory_space<vmem>>, vector<1024x256xbf16>
    %cst = arith.constant dense<0.000000e+00> : vector<8x256xf32>
    %4 = tpu.matmul %2, %3, %cst {dimension_numbers = #tpu.dot_dimension_numbers<[1], [0], [0], [1], [0, 0, 1, 1], [], []>} : vector<8x1024xbf16>, vector<1024x256xbf16>, vector<8x256xf32> -> vector<8x256xf32>
    %c0_4 = arith.constant 0 : index
    %c0_5 = arith.constant 0 : index
    %5 = vector.load %arg4[%c0_4, %c0_5] : memref<1x256xf32, #tpu.memory_space<vmem>>, vector<1x256xf32>
    %6 = vector.broadcast %5 : vector<1x256xf32> to vector<8x256xf32>
    %7 = arith.addf %4, %6 : vector<8x256xf32>
    %cst_6 = arith.constant 0.000000e+00 : f32
    %8 = vector.broadcast %cst_6 : f32 to vector<8x256xf32>
    %9 = arith.maximumf %7, %8 : vector<8x256xf32>
    %10 = tpu.iota {dimensions = array<i32: 0>} : vector<8x256xi32>
    %11 = vector.broadcast %1 : i32 to vector<8x256xi32>
    %12 = arith.addi %10, %11 : vector<8x256xi32>
    %13 = tpu.iota {dimensions = array<i32: 1>} : vector<8x256xi32>
    %c-1640531535_i32 = arith.constant -1640531535 : i32
    %14 = vector.broadcast %c-1640531535_i32 : i32 to vector<8x256xi32>
    %15 = arith.muli %12, %14 : vector<8x256xi32>
    %c-2048144777_i32 = arith.constant -2048144777 : i32
    %16 = vector.broadcast %c-2048144777_i32 : i32 to vector<8x256xi32>
    %17 = arith.muli %13, %16 : vector<8x256xi32>
    %18 = arith.xori %15, %17 : vector<8x256xi32>
    %c1_i32 = arith.constant 1 : i32
    %c668265263_i32 = arith.constant 668265263 : i32
    %19 = arith.muli %c1_i32, %c668265263_i32 : i32
    %20 = arith.addi %0, %19 : i32
    %21 = vector.broadcast %20 : i32 to vector<8x256xi32>
    %22 = arith.xori %18, %21 : vector<8x256xi32>
    %c16_i32 = arith.constant 16 : i32
    %23 = vector.broadcast %c16_i32 : i32 to vector<8x256xi32>
    %24 = arith.shrui %22, %23 : vector<8x256xi32>
    %25 = arith.xori %22, %24 : vector<8x256xi32>
    %c2146121005_i32 = arith.constant 2146121005 : i32
    %26 = vector.broadcast %c2146121005_i32 : i32 to vector<8x256xi32>
    %27 = arith.muli %25, %26 : vector<8x256xi32>
    %c15_i32 = arith.constant 15 : i32
    %28 = vector.broadcast %c15_i32 : i32 to vector<8x256xi32>
    %29 = arith.shrui %27, %28 : vector<8x256xi32>
    %30 = arith.xori %27, %29 : vector<8x256xi32>
    %c-2073254261_i32 = arith.constant -2073254261 : i32
    %31 = vector.broadcast %c-2073254261_i32 : i32 to vector<8x256xi32>
    %32 = arith.muli %30, %31 : vector<8x256xi32>
    %c16_i32_7 = arith.constant 16 : i32
    %33 = vector.broadcast %c16_i32_7 : i32 to vector<8x256xi32>
    %34 = arith.shrui %32, %33 : vector<8x256xi32>
    %35 = arith.xori %32, %34 : vector<8x256xi32>
    %c858993459_i32 = arith.constant 858993459 : i32
    %36 = vector.broadcast %c858993459_i32 : i32 to vector<8x256xi32>
    %37 = arith.cmpi uge, %35, %36 : vector<8x256xi32>
    %cst_8 = arith.constant 1.250000e+00 : f32
    %38 = vector.broadcast %cst_8 : f32 to vector<8x256xf32>
    %39 = arith.mulf %9, %38 : vector<8x256xf32>
    %cst_9 = arith.constant 0.000000e+00 : f32
    %40 = vector.broadcast %cst_9 : f32 to vector<8x256xf32>
    %41 = arith.select %37, %39, %40 : vector<8x256xi1>, vector<8x256xf32>
    %42 = arith.truncf %41 : vector<8x256xf32> to vector<8x256xbf16>
    %c0_10 = arith.constant 0 : index
    %c0_11 = arith.constant 0 : index
    %43 = vector.load %arg5[%c0_10, %c0_11] : memref<256x128xbf16, #tpu.memory_space<vmem>>, vector<256x128xbf16>
    %cst_12 = arith.constant dense<0.000000e+00> : vector<8x128xf32>
    %44 = tpu.matmul %42, %43, %cst_12 {dimension_numbers = #tpu.dot_dimension_numbers<[1], [0], [0], [1], [0, 0, 1, 1], [], []>} : vector<8x256xbf16>, vector<256x128xbf16>, vector<8x128xf32> -> vector<8x128xf32>
    %c0_13 = arith.constant 0 : index
    %c0_14 = arith.constant 0 : index
    %45 = vector.load %arg6[%c0_13, %c0_14] : memref<1x128xf32, #tpu.memory_space<vmem>>, vector<1x128xf32>
    %46 = vector.broadcast %45 : vector<1x128xf32> to vector<8x128xf32>
    %47 = arith.addf %44, %46 : vector<8x128xf32>
    %cst_15 = arith.constant 0.000000e+00 : f32
    %48 = vector.broadcast %cst_15 : f32 to vector<8x128xf32>
    %49 = arith.maximumf %47, %48 : vector<8x128xf32>
    %50 = tpu.iota {dimensions = array<i32: 0>} : vector<8x128xi32>
    %51 = vector.broadcast %1 : i32 to vector<8x128xi32>
    %52 = arith.addi %50, %51 : vector<8x128xi32>
    %53 = tpu.iota {dimensions = array<i32: 1>} : vector<8x128xi32>
    %c-1640531535_i32_16 = arith.constant -1640531535 : i32
    %54 = vector.broadcast %c-1640531535_i32_16 : i32 to vector<8x128xi32>
    %55 = arith.muli %52, %54 : vector<8x128xi32>
    %c-2048144777_i32_17 = arith.constant -2048144777 : i32
    %56 = vector.broadcast %c-2048144777_i32_17 : i32 to vector<8x128xi32>
    %57 = arith.muli %53, %56 : vector<8x128xi32>
    %58 = arith.xori %55, %57 : vector<8x128xi32>
    %c2_i32 = arith.constant 2 : i32
    %c668265263_i32_18 = arith.constant 668265263 : i32
    %59 = arith.muli %c2_i32, %c668265263_i32_18 : i32
    %60 = arith.addi %0, %59 : i32
    %61 = vector.broadcast %60 : i32 to vector<8x128xi32>
    %62 = arith.xori %58, %61 : vector<8x128xi32>
    %c16_i32_19 = arith.constant 16 : i32
    %63 = vector.broadcast %c16_i32_19 : i32 to vector<8x128xi32>
    %64 = arith.shrui %62, %63 : vector<8x128xi32>
    %65 = arith.xori %62, %64 : vector<8x128xi32>
    %c2146121005_i32_20 = arith.constant 2146121005 : i32
    %66 = vector.broadcast %c2146121005_i32_20 : i32 to vector<8x128xi32>
    %67 = arith.muli %65, %66 : vector<8x128xi32>
    %c15_i32_21 = arith.constant 15 : i32
    %68 = vector.broadcast %c15_i32_21 : i32 to vector<8x128xi32>
    %69 = arith.shrui %67, %68 : vector<8x128xi32>
    %70 = arith.xori %67, %69 : vector<8x128xi32>
    %c-2073254261_i32_22 = arith.constant -2073254261 : i32
    %71 = vector.broadcast %c-2073254261_i32_22 : i32 to vector<8x128xi32>
    %72 = arith.muli %70, %71 : vector<8x128xi32>
    %c16_i32_23 = arith.constant 16 : i32
    %73 = vector.broadcast %c16_i32_23 : i32 to vector<8x128xi32>
    %74 = arith.shrui %72, %73 : vector<8x128xi32>
    %75 = arith.xori %72, %74 : vector<8x128xi32>
    %c-2147483648_i32 = arith.constant -2147483648 : i32
    %76 = vector.broadcast %c-2147483648_i32 : i32 to vector<8x128xi32>
    %77 = arith.cmpi uge, %75, %76 : vector<8x128xi32>
    %cst_24 = arith.constant 2.000000e+00 : f32
    %78 = vector.broadcast %cst_24 : f32 to vector<8x128xf32>
    %79 = arith.mulf %49, %78 : vector<8x128xf32>
    %cst_25 = arith.constant 0.000000e+00 : f32
    %80 = vector.broadcast %cst_25 : f32 to vector<8x128xf32>
    %81 = arith.select %77, %79, %80 : vector<8x128xi1>, vector<8x128xf32>
    %82 = arith.truncf %81 : vector<8x128xf32> to vector<8x128xbf16>
    %c0_26 = arith.constant 0 : index
    %c0_27 = arith.constant 0 : index
    %83 = vector.load %arg7[%c0_26, %c0_27] : memref<128x128xbf16, #tpu.memory_space<vmem>>, vector<128x128xbf16>
    %cst_28 = arith.constant dense<0.000000e+00> : vector<8x128xf32>
    %84 = tpu.matmul %82, %83, %cst_28 {dimension_numbers = #tpu.dot_dimension_numbers<[1], [0], [0], [1], [0, 0, 1, 1], [], []>} : vector<8x128xbf16>, vector<128x128xbf16>, vector<8x128xf32> -> vector<8x128xf32>
    %c0_29 = arith.constant 0 : index
    %c0_30 = arith.constant 0 : index
    %85 = vector.load %arg8[%c0_29, %c0_30] : memref<1x128xf32, #tpu.memory_space<vmem>>, vector<1x128xf32>
    %86 = vector.broadcast %85 : vector<1x128xf32> to vector<8x128xf32>
    %87 = arith.addf %84, %86 : vector<8x128xf32>
    %cst_31 = arith.constant 0.000000e+00 : f32
    %88 = vector.broadcast %cst_31 : f32 to vector<8x128xf32>
    %89 = arith.maximumf %87, %88 : vector<8x128xf32>
    %c0_32 = arith.constant 0 : index
    %c0_33 = arith.constant 0 : index
    %90 = vector.load %arg9[%c0_32, %c0_33] : memref<8x128xf32, #tpu.memory_space<vmem>>, vector<8x128xf32>
    tpu.vector_store %arg9[%c0_32, %c0_33], %89 {strides = array<i32>} : memref<8x128xf32, #tpu.memory_space<vmem>>, vector<8x128xf32>,
    return
  }
  func.func @transform_0(%arg0: i32, %arg1: memref<1xi32, #tpu.memory_space<smem>>) -> (i32, i32) {
    %c0_i32 = arith.constant 0 : i32
    %c0_i32_0 = arith.constant 0 : i32
    return %arg0, %c0_i32 : i32, i32
  }
  func.func @transform_1(%arg0: i32, %arg1: memref<1xi32, #tpu.memory_space<smem>>) -> (i32, i32) {
    %c0_i32 = arith.constant 0 : i32
    %c0_i32_0 = arith.constant 0 : i32
    %c0_i32_1 = arith.constant 0 : i32
    return %c0_i32, %c0_i32_0 : i32, i32
  }
  func.func @transform_2(%arg0: i32, %arg1: memref<1xi32, #tpu.memory_space<smem>>) -> (i32, i32) {
    %c0_i32 = arith.constant 0 : i32
    %c0_i32_0 = arith.constant 0 : i32
    %c0_i32_1 = arith.constant 0 : i32
    return %c0_i32, %c0_i32_0 : i32, i32
  }
  func.func @transform_3(%arg0: i32, %arg1: memref<1xi32, #tpu.memory_space<smem>>) -> (i32, i32) {
    %c0_i32 = arith.constant 0 : i32
    %c0_i32_0 = arith.constant 0 : i32
    %c0_i32_1 = arith.constant 0 : i32
    return %c0_i32, %c0_i32_0 : i32, i32
  }
  func.func @transform_4(%arg0: i32, %arg1: memref<1xi32, #tpu.memory_space<smem>>) -> (i32, i32) {
    %c0_i32 = arith.constant 0 : i32
    %c0_i32_0 = arith.constant 0 : i32
    %c0_i32_1 = arith.constant 0 : i32
    return %c0_i32, %c0_i32_0 : i32, i32
  }
  func.func @transform_5(%arg0: i32, %arg1: memref<1xi32, #tpu.memory_space<smem>>) -> (i32, i32) {
    %c0_i32 = arith.constant 0 : i32
    %c0_i32_0 = arith.constant 0 : i32
    %c0_i32_1 = arith.constant 0 : i32
    return %c0_i32, %c0_i32_0 : i32, i32
  }
  func.func @transform_6(%arg0: i32, %arg1: memref<1xi32, #tpu.memory_space<smem>>) -> (i32, i32) {
    %c0_i32 = arith.constant 0 : i32
    %c0_i32_0 = arith.constant 0 : i32
    %c0_i32_1 = arith.constant 0 : i32
    return %c0_i32, %c0_i32_0 : i32, i32
  }
  func.func @transform_7(%arg0: i32, %arg1: memref<1xi32, #tpu.memory_space<smem>>) -> (i32, i32) {
    %c0_i32 = arith.constant 0 : i32
    %c0_i32_0 = arith.constant 0 : i32
    return %arg0, %c0_i32 : i32, i32
  }
}

</mosaic_0001>

<bundles_post_ra>
// kernel: tpu_custom_call.1
= control target key start
LH: loop header
LB: loop body
LE: loop exit
PB: predicated region body
PF: predicated region fallthrough
CT: control target
= control target key end

     0   :  { %14 = vsyncpa [#allocation5], 0  ;;  %s2173_s0 = inlined_call_operand.<no memory space> [shape: s32[1], index: 0, kind: input, shape index: {}]   ;;  %s2174_s1 = inlined_call_operand.hbm [shape: bf16[8,1024], index: 1, kind: input, shape index: {}]   ;;  %s2175_s2 = inlined_call_operand.hbm [shape: bf16[1024,256], index: 2, kind: input, shape index: {}]   ;;  %s2176_s3 = inlined_call_operand.vmem [shape: f32[1,256], index: 3, kind: input, shape index: {}]   ;;  %s2177_s4 = inlined_call_operand.hbm [shape: bf16[256,128], index: 4, kind: input, shape index: {}]   ;;  %s2178_s5 = inlined_call_operand.vmem [shape: f32[1,128], index: 5, kind: input, shape index: {}]   ;;  %s2179_s6 = inlined_call_operand.hbm [shape: bf16[128,128], index: 6, kind: input, shape index: {}]   ;;  %s2180_s7 = inlined_call_operand.vmem [shape: f32[1,128], index: 7, kind: input, shape index: {}]   ;;  %s2181_s8 = inlined_call_operand.hbm [shape: f32[8,128], index: 8, kind: output, shape index: {}]  }
   0x1   :  { %15 = vsyncpa [#allocation8], 0 }
   0x2   :  { %16 = vsyncpa [#allocation11], 0 }
   0x3   :  { %17 = vsyncpa [#allocation6], 0  ;;  %s2011_s27 = smov [#allocation7]   ;;  %s1893_s9 = scalar_lea.hbm %s2175_s2, 16384 }
   0x4   :  { %s33_s28 = sshll.u32 %s2011_s27, 4  ;;  %p1894_p0 = scmp.ne.s32.totalorder %s2175_s2, %s1893_s9  ;;  %s34_s28 = int_to_ptr.vmem [resolvable:$true] %s33_s28 }
   0x5   :  { %p1897_p1 = scmp.lt.u32.totalorder %s1893_s9, %s2175_s2 }
   0x7   :  { %p1899_p2 = pnand %p1897_p1, %p1894_p0 }
   0x9   :  { %1902 = shalt.err (!%p1899_p2)
}
   0xa   :  { %s1903_s14 = scalar_lea.vmem %s34_s28, 16384  ;;  %p1908_p4 = scmp.lt.s32.totalorder %s34_s28, %s34_s28 }
   0xb   :  { %p1904_p3 = scmp.ne.s32.totalorder %s34_s28, %s1903_s14  ;;  %p1909_p5 = scmp.lt.s32.totalorder %s1903_s14, %s1903_s14 }
   0xd   :  { %p1910_p6 = por %p1909_p5, %p1908_p4 }
   0xf   :  { %p1911_p7 = pnand %p1910_p6, %p1904_p3 }
  0x11   :  { %1914 = shalt.err (!%p1911_p7)
}
  0x12   :  { %s2012_s15 = smov 128   ;;  %s2013_s16 = smov 8  }
  0x13   :  { %39 = dma.hbm_to_vmem [thread:$0]  %s2175_s2, 16384, %s34_s28, [#allocation8], %s2012_s15, %s2012_s15, %s2013_s16  }
  0x14   :  { %s2014_s19 = smov [#allocation4]   ;;  %s2015_s21 = smov [#allocation9]  }
  0x15   :  { %s24_s20 = sshll.u32 %s2014_s19, 4  ;;  %s47_s22 = sshll.u32 %s2015_s21, 4  ;;  %s25_s20 = int_to_ptr.vmem [resolvable:$true] %s24_s20  ;;  %s48_s22 = int_to_ptr.vmem [resolvable:$true] %s47_s22 }
  0x16   :  { %s1915_s25 = scalar_lea.hbm %s2174_s1, 512 }
  0x17   :  { %p1916_p8 = scmp.ne.s32.totalorder %s2174_s1, %s1915_s25  ;;  %p1919_p9 = scmp.lt.u32.totalorder %s1915_s25, %s2174_s1 }
  0x19   :  { %p1921_p10 = pnand %p1919_p9, %p1916_p8 }
  0x1b   :  { %1924 = shalt.err (!%p1921_p10)
}
  0x1c   :  { %s1925_s2 = scalar_lea.vmem %s25_s20, 512  ;;  %p1930_p12 = scmp.lt.s32.totalorder %s25_s20, %s25_s20 }
  0x1d   :  { %p1926_p11 = scmp.ne.s32.totalorder %s25_s20, %s1925_s2  ;;  %p1931_p13 = scmp.lt.s32.totalorder %s1925_s2, %s1925_s2 }
  0x1f   :  { %p1932_p0 = por %p1931_p13, %p1930_p12 }
  0x21   :  { %p1933_p1 = pnand %p1932_p0, %p1926_p11 }
  0x23   :  { %1936 = shalt.err (!%p1933_p1)
}
  0x24   :  { %27 = dma.hbm_to_vmem [thread:$0]  %s2174_s1, 512, %s25_s20, [#allocation5]  }
  0x25   :  { %s1937_s12 = scalar_lea.hbm %s2177_s4, 2048 }
  0x26   :  { %p1938_p2 = scmp.ne.s32.totalorder %s2177_s4, %s1937_s12  ;;  %p1941_p3 = scmp.lt.u32.totalorder %s1937_s12, %s2177_s4 }
  0x28   :  { %p1943_p4 = pnand %p1941_p3, %p1938_p2 }
  0x2a   :  { %1946 = shalt.err (!%p1943_p4)
}
  0x2b   :  { %s1947_s17 = scalar_lea.vmem %s48_s22, 2048  ;;  %p1952_p6 = scmp.lt.s32.totalorder %s48_s22, %s48_s22 }
  0x2c   :  { %p1948_p5 = scmp.ne.s32.totalorder %s48_s22, %s1947_s17  ;;  %p1953_p7 = scmp.lt.s32.totalorder %s1947_s17, %s1947_s17 }
  0x2e   :  { %p1954_p8 = por %p1953_p7, %p1952_p6 }
  0x30   :  { %p1955_p9 = pnand %p1954_p8, %p1948_p5 }
  0x32   :  { %1958 = shalt.err (!%p1955_p9)
}
  0x33   :  { %s2016_s1 = smov 64   ;;  %s2017_s18 = smov 4  }
  0x34   :  { %53 = dma.hbm_to_vmem [thread:$0]  %s2177_s4, 2048, %s48_s22, [#allocation8], %s2016_s1, %s2016_s1, %s2017_s18  }
  0x35   :  { %s2018_s21 = smov [#allocation10]   ;;  %s1959_s26 = scalar_lea.hbm %s2179_s6, 1024 }
  0x36   :  { %s61_s23 = sshll.u32 %s2018_s21, 4  ;;  %p1960_p10 = scmp.ne.s32.totalorder %s2179_s6, %s1959_s26  ;;  %s62_s23 = int_to_ptr.vmem [resolvable:$true] %s61_s23 }
  0x37   :  { %p1963_p11 = scmp.lt.u32.totalorder %s1959_s26, %s2179_s6 }
  0x39   :  { %p1965_p12 = pnand %p1963_p11, %p1960_p10 }
  0x3b   :  { %1968 = shalt.err (!%p1965_p12)
}
  0x3c   :  { %s1969_s28 = scalar_lea.vmem %s62_s23, 1024  ;;  %p1974_p0 = scmp.lt.s32.totalorder %s62_s23, %s62_s23 }
  0x3d   :  { %p1970_p13 = scmp.ne.s32.totalorder %s62_s23, %s1969_s28  ;;  %p1975_p1 = scmp.lt.s32.totalorder %s1969_s28, %s1969_s28 }
  0x3f   :  { %p1976_p2 = por %p1975_p1, %p1974_p0 }
  0x41   :  { %p1977_p3 = pnand %p1976_p2, %p1970_p13 }
  0x43   :  { %1980 = shalt.err (!%p1977_p3)
}
  0x44   :  { %67 = dma.hbm_to_vmem [thread:$0]  %s2179_s6, 1024, %s62_s23, [#allocation11], %s2016_s1, %s2016_s1, %s2017_s18  }
  0x45   :  { %2003 = dma.done.wait [#allocation5], 512  }
  0x46   :  { %2004 = vsyncadd [#allocation5], 4294966784 }
  0x47   :  { %2005 = dma.done.wait [#allocation8], 18432  }
  0x48   :  { %2006 = vsyncadd [#allocation8], 4294948864 }
  0x49   :  { %2007 = dma.done.wait [#allocation11], 1024  }
  0x4a   :  { %2008 = vsyncadd [#allocation11], 4294966272  ;;  %v1669_v0 = vld [vmem:[#allocation7 + $0x104] ss:$8 sps:$4 sm:$0xff]   ;;  %v1671_v1 = vld [vmem:[#allocation7 + $0x100] ss:$8 sps:$4 sm:$0xff]  }
  0x4b   :  { %938 = vmatprep.subr.bf16.mxu0 %v1669_v0  ;;  %v1672_v2 = vld [vmem:[#allocation7 + $0x114] ss:$8 sps:$4 sm:$0xff]   ;;  %v1674_v3 = vld [vmem:[#allocation7 + $0x110] ss:$8 sps:$4 sm:$0xff]   ;;  %v1675_v4 = vld [vmem:[#allocation7 + $0x124] ss:$8 sps:$4 sm:$0xff]  }
  0x4c   :  { %939 = vmatpush1.bf16.msra.mxu0 %v1671_v1  ;;  %v1677_v5 = vld [vmem:[#allocation7 + $0x120] ss:$8 sps:$4 sm:$0xff]   ;;  %v1678_v6 = vld [vmem:[#allocation7 + $0x134] ss:$8 sps:$4 sm:$0xff]   ;;  %v1680_v7 = vld [vmem:[#allocation7 + $0x130] ss:$8 sps:$4 sm:$0xff]  }
  0x4d   :  { %940 = vmatprep.subr.bf16.mxu0 %v1672_v2  ;;  %v1681_v8 = vld [vmem:[#allocation7 + $0x144] ss:$8 sps:$4 sm:$0xff]   ;;  %v1683_v9 = vld [vmem:[#allocation7 + $0x140] ss:$8 sps:$4 sm:$0xff]   ;;  %v1684_v10 = vld [vmem:[#allocation7 + $0x154] ss:$8 sps:$4 sm:$0xff]  }
  0x4e   :  { %v1686_v11 = vld [vmem:[#allocation7 + $0x150] ss:$8 sps:$4 sm:$0xff]   ;;  %v1687_v12 = vld [vmem:[#allocation7 + $0x164] ss:$8 sps:$4 sm:$0xff]   ;;  %v1689_v15 = vld [vmem:[#allocation7 + $0x160] ss:$8 sps:$4 sm:$0xff]  }
  0x4f   :  { %v2115_v13 = vld [vmem:[#allocation4 + $0x8] sm:$0xff]  ;;  %v1690_v16 = vld [vmem:[#allocation7 + $0x174] ss:$8 sps:$4 sm:$0xff]   ;;  %v1692_v17 = vld [vmem:[#allocation7 + $0x170] ss:$8 sps:$4 sm:$0xff]   ;;  %vm2020_vm4 = vmmov 0  }
  0x50   :  { %941 = vmatpush1.bf16.msra.mxu0 %v1674_v3  ;;  %v1427_v14 = vcombine.high %v2115_v13, %v2115_v13  ;;  %v1693_v18 = vld [vmem:[#allocation7 + $0x184] ss:$8 sps:$4 sm:$0xff]   ;;  %v1695_v19 = vld [vmem:[#allocation7 + $0x180] ss:$8 sps:$4 sm:$0xff]   ;;  %v1696_v20 = vld [vmem:[#allocation7 + $0x194] ss:$8 sps:$4 sm:$0xff]   ;;  %v1426_v48 = vcombine.low %v2115_v13, %v2115_v13 }
  0x51   :  { %942 = vmatprep.subr.bf16.mxu0 %v1675_v4  ;;  %v1698_v21 = vld [vmem:[#allocation7 + $0x190] ss:$8 sps:$4 sm:$0xff]   ;;  %v1699_v22 = vld [vmem:[#allocation7 + $0x1a4] ss:$8 sps:$4 sm:$0xff]   ;;  %v1701_v23 = vld [vmem:[#allocation7 + $0x1a0] ss:$8 sps:$4 sm:$0xff]  }
  0x52   :  { %970 = vmatprep.mubr.bf16.mxu0 %v1427_v14  ;;  %v1702_v24 = vld [vmem:[#allocation7 + $0x1b4] ss:$8 sps:$4 sm:$0xff]   ;;  %v1764_v25 = vld [vmem:[#allocation7 + $0x4] ss:$8 sps:$4 sm:$0xff]   ;;  %v1766_v26 = vld [vmem:[#allocation7] ss:$8 sps:$4 sm:$0xff]  }
  0x53   :  { %v1704_v27 = vld [vmem:[#allocation7 + $0x1b0] ss:$8 sps:$4 sm:$0xff]   ;;  %v1705_v28 = vld [vmem:[#allocation7 + $0x1c4] ss:$8 sps:$4 sm:$0xff]   ;;  %897 = vmatprep.subr.bf16.mxu1 %v1764_v25  ;;  %v1770_v29 = vld [vmem:[#allocation7 + $0x14] ss:$8 sps:$4 sm:$0xff]  }
  0x54   :  { %943 = vmatpush1.bf16.msra.mxu0 %v1677_v5  ;;  %898 = vmatpush1.bf16.msra.mxu1 %v1766_v26  ;;  %v1772_v30 = vld [vmem:[#allocation7 + $0x10] ss:$8 sps:$4 sm:$0xff]   ;;  %v1707_v31 = vld [vmem:[#allocation7 + $0x1c0] ss:$8 sps:$4 sm:$0xff]   ;;  %v1708_v32 = vld [vmem:[#allocation7 + $0x1d4] ss:$8 sps:$4 sm:$0xff]  }
  0x55   :  { %944 = vmatprep.subr.bf16.mxu0 %v1678_v6  ;;  %899 = vmatprep.subr.bf16.mxu1 %v1770_v29  ;;  %v1778_v33 = vld [vmem:[#allocation7 + $0x24] ss:$8 sps:$4 sm:$0xff]   ;;  %v1780_v34 = vld [vmem:[#allocation7 + $0x20] ss:$8 sps:$4 sm:$0xff]   ;;  %v1784_v35 = vld [vmem:[#allocation7 + $0x34] ss:$8 sps:$4 sm:$0xff]  }
  0x56   :  { %v1710_v36 = vld [vmem:[#allocation7 + $0x1d0] ss:$8 sps:$4 sm:$0xff]   ;;  %v1711_v37 = vld [vmem:[#allocation7 + $0x1e4] ss:$8 sps:$4 sm:$0xff]   ;;  %v1713_v40 = vld [vmem:[#allocation7 + $0x1e0] ss:$8 sps:$4 sm:$0xff]  }
  0x57   :  { %v1786_v38 = vld [vmem:[#allocation7 + $0x30] ss:$8 sps:$4 sm:$0xff]   ;;  %v1790_v39 = vld [vmem:[#allocation7 + $0x44] ss:$8 sps:$4 sm:$0xff]   ;;  %v1714_v41 = vld [vmem:[#allocation7 + $0x1f4] ss:$8 sps:$4 sm:$0xff]  }
  0x58   :  { %945 = vmatpush1.bf16.msra.mxu0 %v1680_v7  ;;  %900 = vmatpush1.bf16.msra.mxu1 %v1772_v30  ;;  %v1792_v42 = vld [vmem:[#allocation7 + $0x40] ss:$8 sps:$4 sm:$0xff]   ;;  %v1796_v43 = vld [vmem:[#allocation7 + $0x54] ss:$8 sps:$4 sm:$0xff]   ;;  %v1716_v44 = vld [vmem:[#allocation7 + $0x1f0] ss:$8 sps:$4 sm:$0xff]  }
  0x59   :  { %946 = vmatprep.subr.bf16.mxu0 %v1681_v8  ;;  %901 = vmatprep.subr.bf16.mxu1 %v1778_v33  ;;  %v1721_v45 = vld [vmem:[#allocation7 + $0x204] ss:$8 sps:$4 sm:$0xff]   ;;  %v2119_v46 = vld [vmem:[#allocation4 + $0x10] sm:$0xff]  ;;  %v1719_v50 = vld [vmem:[#allocation7 + $0x200] ss:$8 sps:$4 sm:$0xff]   ;;  %s2021_s1 = smov [#allocation12]  }
  0x5a   :  { %v1798_v47 = vld [vmem:[#allocation7 + $0x50] ss:$8 sps:$4 sm:$0xff]   ;;  %v1802_v49 = vld [vmem:[#allocation7 + $0x64] ss:$8 sps:$4 sm:$0xff]   ;;  %v1429_v51 = vcombine.high %v2119_v46, %v2119_v46  ;;  %v1724_v52 = vld [vmem:[#allocation7 + $0x214] ss:$8 sps:$4 sm:$0xff]  }
  0x5b   :  { %v1804_v53 = vld [vmem:[#allocation7 + $0x60] ss:$8 sps:$4 sm:$0xff]   ;;  %v1808_v54 = vld [vmem:[#allocation7 + $0x74] ss:$8 sps:$4 sm:$0xff]   ;;  %v1722_v55 = vld [vmem:[#allocation7 + $0x210] ss:$8 sps:$4 sm:$0xff]  }
  0x5c   :  { %947 = vmatpush1.bf16.msra.mxu0 %v1683_v9  ;;  %902 = vmatpush1.bf16.msra.mxu1 %v1780_v34  ;;  %v1727_v56 = vld [vmem:[#allocation7 + $0x224] ss:$8 sps:$4 sm:$0xff]   ;;  %v1810_v57 = vld [vmem:[#allocation7 + $0x70] ss:$8 sps:$4 sm:$0xff]   ;;  %v1725_v59 = vld [vmem:[#allocation7 + $0x220] ss:$8 sps:$4 sm:$0xff]  }
  0x5d   :  { %948 = vmatprep.subr.bf16.mxu0 %v1684_v10  ;;  %903 = vmatprep.subr.bf16.mxu1 %v1784_v35  ;;  %v1814_v58 = vld [vmem:[#allocation7 + $0x84] ss:$8 sps:$4 sm:$0xff]   ;;  %v1730_v60 = vld [vmem:[#allocation7 + $0x234] ss:$8 sps:$4 sm:$0xff]   ;;  %v1816_v61 = vld [vmem:[#allocation7 + $0x80] ss:$8 sps:$4 sm:$0xff]  }
  0x5e   :  { %v1820_v62 = vld [vmem:[#allocation7 + $0x94] ss:$8 sps:$4 sm:$0xff]   ;;  %v1728_v63 = vld [vmem:[#allocation7 + $0x230] ss:$8 sps:$4 sm:$0xff]   ;;  %v1733_v0 = vld [vmem:[#allocation7 + $0x244] ss:$8 sps:$4 sm:$0xff]  }
  0x5f   :  { %v1822_v1 = vld [vmem:[#allocation7 + $0x90] ss:$8 sps:$4 sm:$0xff]   ;;  %v1826_v2 = vld [vmem:[#allocation7 + $0xa4] ss:$8 sps:$4 sm:$0xff]   ;;  %v1731_v3 = vld [vmem:[#allocation7 + $0x240] ss:$8 sps:$4 sm:$0xff]  }
  0x60   :  { %949 = vmatpush1.bf16.msra.mxu0 %v1686_v11  ;;  %904 = vmatpush1.bf16.msra.mxu1 %v1786_v38  ;;  %v1736_v4 = vld [vmem:[#allocation7 + $0x254] ss:$8 sps:$4 sm:$0xff]   ;;  %v1828_v5 = vld [vmem:[#allocation7 + $0xa0] ss:$8 sps:$4 sm:$0xff]   ;;  %v1734_v7 = vld [vmem:[#allocation7 + $0x250] ss:$8 sps:$4 sm:$0xff]  }
  0x61   :  { %950 = vmatprep.subr.bf16.mxu0 %v1687_v12  ;;  %905 = vmatprep.subr.bf16.mxu1 %v1790_v39  ;;  %v1832_v6 = vld [vmem:[#allocation7 + $0xb4] ss:$8 sps:$4 sm:$0xff]   ;;  %v1739_v8 = vld [vmem:[#allocation7 + $0x264] ss:$8 sps:$4 sm:$0xff]   ;;  %v1834_v10 = vld [vmem:[#allocation7 + $0xb0] ss:$8 sps:$4 sm:$0xff]  }
  0x62   :  { %v85_v9 = vld [vmem:[#allocation4] sm:$0xff]  ;;  %v1742_v14 = vld [vmem:[#allocation7 + $0x274] ss:$8 sps:$4 sm:$0xff]   ;;  %v1746_v25 = vld [vmem:[#allocation7 + $0x290] ss:$8 sps:$4 sm:$0xff]   ;;  %s1413_s18 = sshll.u32 %s2021_s1, 4  ;;  %s1414_s18 = int_to_ptr.vmem [resolvable:$true] %s1413_s18 }
  0x63   :  { %v1425_v11 = vcombine.high %v85_v9, %v85_v9  ;;  %v1838_v12 = vld [vmem:[#allocation7 + $0xc4] ss:$8 sps:$4 sm:$0xff]   ;;  %v1737_v13 = vld [vmem:[#allocation7 + $0x260] ss:$8 sps:$4 sm:$0xff]   ;;  %v1754_v30 = vld [vmem:[#allocation7 + $0x2b4] ss:$8 sps:$4 sm:$0xff]   ;;  %p1986_p5 = scmp.lt.s32.totalorder %s1414_s18, %s1414_s18 }
  0x64   :  { %951 = vmatpush1.bf16.msra.mxu0 %v1689_v15  ;;  %906 = vmatpush1.bf16.msra.mxu1 %v1792_v42  ;;  %v1840_v15 = vld [vmem:[#allocation7 + $0xc0] ss:$8 sps:$4 sm:$0xff]   ;;  %v1751_v26 = vld [vmem:[#allocation7 + $0x2a4] ss:$8 sps:$4 sm:$0xff]   ;;  %v1752_v34 = vld [vmem:[#allocation7 + $0x2b0] ss:$8 sps:$4 sm:$0xff]  }
  0x65   :  { %952 = vmatprep.subr.bf16.mxu0 %v1690_v16  ;;  %907 = vmatprep.subr.bf16.mxu1 %v1796_v43  ;;  %v1844_v16 = vld [vmem:[#allocation7 + $0xd4] ss:$8 sps:$4 sm:$0xff]   ;;  %v1749_v29 = vld [vmem:[#allocation7 + $0x2a0] ss:$8 sps:$4 sm:$0xff]   ;;  %v1757_v35 = vld [vmem:[#allocation7 + $0x2c4] ss:$8 sps:$4 sm:$0xff]  }
  0x66   :  { %929 = vmatprep.mubr.bf16.mxu1 %v1425_v11  ;;  %v1871_v33 = vld [vmem:[#allocation9 + $0x48] sm:$0xff]   ;;  %v1760_v39 = vld [vmem:[#allocation7 + $0x2d4] ss:$8 sps:$4 sm:$0xff]   ;;  %v1758_v42 = vld [vmem:[#allocation7 + $0x2d0] ss:$8 sps:$4 sm:$0xff]  }
  0x67   :  { %v1755_v38 = vld [vmem:[#allocation7 + $0x2c0] ss:$8 sps:$4 sm:$0xff]   ;;  %v1763_v43 = vld [vmem:[#allocation7 + $0x2e4] ss:$8 sps:$4 sm:$0xff]   ;;  %s1075_s10 = sadd.s32 668265263, %s2173_s0 }
  0x68   :  { %953 = vmatpush1.bf16.msra.mxu0 %v1692_v17  ;;  %908 = vmatpush1.bf16.msra.mxu1 %v1798_v47  ;;  %v1740_v17 = vld [vmem:[#allocation7 + $0x270] ss:$8 sps:$4 sm:$0xff]   ;;  %v1769_v47 = vld [vmem:[#allocation7 + $0x2f4] ss:$8 sps:$4 sm:$0xff]   ;;  %v1849_v11 = vld [vmem:[#allocation7 + $0x3c4] ss:$8 sps:$4 sm:$0xff]  }
  0x69   :  { %954 = vmatprep.subr.bf16.mxu0 %v1693_v18  ;;  %909 = vmatprep.subr.bf16.mxu1 %v1802_v49  ;;  %v1745_v18 = vld [vmem:[#allocation7 + $0x284] ss:$8 sps:$4 sm:$0xff]   ;;  %s1279_s14 = sadd.s32 1336530526, %s2173_s0 }
  0x6a   :  { %v1777_v49 = vld [vmem:[#allocation7 + $0x304] ss:$8 sps:$4 sm:$0xff]  }
  0x6c   :  { %955 = vmatpush1.bf16.msra.mxu0 %v1695_v19  ;;  %910 = vmatpush1.bf16.msra.mxu1 %v1804_v53  ;;  %v1743_v19 = vld [vmem:[#allocation7 + $0x280] ss:$8 sps:$4 sm:$0xff]  }
  0x6d   :  { %956 = vmatprep.subr.bf16.mxu0 %v1696_v20  ;;  %911 = vmatprep.subr.bf16.mxu1 %v1808_v54  ;;  %v1846_v20 = vld [vmem:[#allocation7 + $0xd0] ss:$8 sps:$4 sm:$0xff]   ;;  %v1783_v54 = vld [vmem:[#allocation7 + $0x314] ss:$8 sps:$4 sm:$0xff]  }
  0x70   :  { %957 = vmatpush1.bf16.msra.mxu0 %v1698_v21  ;;  %912 = vmatpush1.bf16.msra.mxu1 %v1810_v57  ;;  %v1748_v21 = vld [vmem:[#allocation7 + $0x294] ss:$8 sps:$4 sm:$0xff]   ;;  %v1787_v57 = vld [vmem:[#allocation7 + $0x320] ss:$8 sps:$4 sm:$0xff]  }
  0x71   :  { %958 = vmatprep.subr.bf16.mxu0 %v1699_v22  ;;  %913 = vmatprep.subr.bf16.mxu1 %v1814_v58  ;;  %v1850_v22 = vld [vmem:[#allocation7 + $0xe4] ss:$8 sps:$4 sm:$0xff]   ;;  %v1795_v58 = vld [vmem:[#allocation7 + $0x334] ss:$8 sps:$4 sm:$0xff]  }
  0x74   :  { %959 = vmatpush1.bf16.msra.mxu0 %v1701_v23  ;;  %914 = vmatpush1.bf16.msra.mxu1 %v1816_v61  ;;  %v1852_v23 = vld [vmem:[#allocation7 + $0xe0] ss:$8 sps:$4 sm:$0xff]   ;;  %v1807_v61 = vld [vmem:[#allocation7 + $0x354] ss:$8 sps:$4 sm:$0xff]  }
  0x75   :  { %960 = vmatprep.subr.bf16.mxu0 %v1702_v24  ;;  %915 = vmatprep.subr.bf16.mxu1 %v1820_v62  ;;  %v1856_v24 = vld [vmem:[#allocation7 + $0xf4] ss:$8 sps:$4 sm:$0xff]   ;;  %v1805_v62 = vld [vmem:[#allocation7 + $0x350] ss:$8 sps:$4 sm:$0xff]  }
  0x78   :  { %961 = vmatpush1.bf16.msra.mxu0 %v1704_v27  ;;  %916 = vmatpush1.bf16.msra.mxu1 %v1822_v1  ;;  %v1858_v27 = vld [vmem:[#allocation7 + $0xf0] ss:$8 sps:$4 sm:$0xff]   ;;  %v1819_v1 = vld [vmem:[#allocation7 + $0x374] ss:$8 sps:$4 sm:$0xff]  }
  0x79   :  { %962 = vmatprep.subr.bf16.mxu0 %v1705_v28  ;;  %917 = vmatprep.subr.bf16.mxu1 %v1826_v2  ;;  %v1869_v28 = vld [vmem:[#allocation9 + $0x40] sm:$0xff]   ;;  %v1817_v2 = vld [vmem:[#allocation7 + $0x370] ss:$8 sps:$4 sm:$0xff]  }
  0x7c   :  { %963 = vmatpush1.bf16.msra.mxu0 %v1707_v31  ;;  %918 = vmatpush1.bf16.msra.mxu1 %v1828_v5  ;;  %v1424_v31 = vcombine.low %v85_v9, %v85_v9  ;;  %v1831_v5 = vld [vmem:[#allocation7 + $0x394] ss:$8 sps:$4 sm:$0xff]  }
  0x7d   :  { %964 = vmatprep.subr.bf16.mxu0 %v1708_v32  ;;  %919 = vmatprep.subr.bf16.mxu1 %v1832_v6  ;;  %v1870_v32 = vld [vmem:[#allocation9] sm:$0xff]   ;;  %v1829_v6 = vld [vmem:[#allocation7 + $0x390] ss:$8 sps:$4 sm:$0xff]   ;;  %v1843_v9 = vld [vmem:[#allocation7 + $0x3b4] ss:$8 sps:$4 sm:$0xff]  }
  0x80   :  { %965 = vmatpush1.bf16.msra.mxu0 %v1710_v36  ;;  %920 = vmatpush1.bf16.msra.mxu1 %v1834_v10  ;;  %v1872_v36 = vld [vmem:[#allocation9 + $0x8] sm:$0xff]   ;;  %v1841_v10 = vld [vmem:[#allocation7 + $0x3b0] ss:$8 sps:$4 sm:$0xff]  }
  0x81   :  { %966 = vmatprep.subr.bf16.mxu0 %v1711_v37  ;;  %921 = vmatprep.subr.bf16.mxu1 %v1838_v12  ;;  %v1873_v37 = vld [vmem:[#allocation9 + $0x50] sm:$0xff]   ;;  %v1847_v12 = vld [vmem:[#allocation7 + $0x3c0] ss:$8 sps:$4 sm:$0xff]  }
  0x84   :  { %967 = vmatpush1.bf16.msra.mxu0 %v1713_v40  ;;  %922 = vmatpush1.bf16.msra.mxu1 %v1840_v15  ;;  %v1874_v40 = vld [vmem:[#allocation9 + $0x10] sm:$0xff]   ;;  %v1861_v15 = vld [vmem:[#allocation7 + $0x3e4] ss:$8 sps:$4 sm:$0xff]  }
  0x85   :  { %968 = vmatprep.subr.bf16.mxu0 %v1714_v41  ;;  %923 = vmatprep.subr.bf16.mxu1 %v1844_v16  ;;  %v1875_v41 = vld [vmem:[#allocation9 + $0x58] sm:$0xff]   ;;  %v1859_v16 = vld [vmem:[#allocation7 + $0x3e0] ss:$8 sps:$4 sm:$0xff]  }
  0x88   :  { %969 = vmatpush1.bf16.msra.mxu0 %v1716_v44  ;;  %924 = vmatpush1.bf16.msra.mxu1 %v1846_v20  ;;  %v1876_v44 = vld [vmem:[#allocation9 + $0x18] sm:$0xff]   ;;  %v1877_v20 = vld [vmem:[#allocation9 + $0x60] sm:$0xff]  }
  0x89   :  { %979 = vmatprep.subr.bf16.mxu0 %v1721_v45  ;;  %925 = vmatprep.subr.bf16.mxu1 %v1850_v22  ;;  %v1761_v45 = vld [vmem:[#allocation7 + $0x2e0] ss:$8 sps:$4 sm:$0xff]  }
  0x8a   :  { %v1879_v22 = vld [vmem:[#allocation9 + $0x68] sm:$0xff]  }
  0x8b   :  { %971 = vmatmul.mubr.bf16.vlgmr.msra.gmra.mrb[0].mxu0 %v1426_v48  ;;  %v1767_v48 = vld [vmem:[#allocation7 + $0x2f0] ss:$8 sps:$4 sm:$0xff]  }
  0x8c   :  { %980 = vmatpush1.bf16.msra.mxu0 %v1719_v50  ;;  %1011 = vmatprep.mubr.bf16.mxu0 %v1429_v51  ;;  %v2125_v50 = vld [vmem:[#allocation4 + $0x18] sm:$0xff]  ;;  %v1428_v51 = vcombine.low %v2119_v46, %v2119_v46  ;;  %v1801_v46 = vld [vmem:[#allocation7 + $0x344] ss:$8 sps:$4 sm:$0xff]  }
  0x8d   :  { %981 = vmatprep.subr.bf16.mxu0 %v1724_v52  ;;  %926 = vmatpush1.bf16.msra.mxu1 %v1852_v23  ;;  %v1775_v52 = vld [vmem:[#allocation7 + $0x300] ss:$8 sps:$4 sm:$0xff]   ;;  %v1431_v53 = vcombine.high %v2125_v50, %v2125_v50 }
  0x8e   :  { %927 = vmatprep.subr.bf16.mxu1 %v1856_v24  ;;  %v1880_v23 = vld [vmem:[#allocation9 + $0x28] sm:$0xff]   ;;  %v1881_v24 = vld [vmem:[#allocation9 + $0x70] sm:$0xff]  }
  0x90   :  { %982 = vmatpush1.bf16.msra.mxu0 %v1722_v55  ;;  %v1781_v55 = vld [vmem:[#allocation7 + $0x310] ss:$8 sps:$4 sm:$0xff]  }
  0x91   :  { %983 = vmatprep.subr.bf16.mxu0 %v1727_v56  ;;  %928 = vmatpush1.bf16.msra.mxu1 %v1858_v27  ;;  %v1789_v56 = vld [vmem:[#allocation7 + $0x324] ss:$8 sps:$4 sm:$0xff]   ;;  %v1884_v27 = vld [vmem:[#allocation9 + $0x38] sm:$0xff]  }
  0x92   :  { %1595 = vmatprep.subr.bf16.mxu1 %v1869_v28  ;;  %v2019_v28 = vmov 0.0  }
  0x94   :  { %984 = vmatpush1.bf16.msra.mxu0 %v1725_v59  ;;  %930 = vmatmul.mubr.bf16.vlgmr.msra.gmra.mrb[0].mxu1 %v1424_v31  ;;  %v1793_v59 = vld [vmem:[#allocation7 + $0x330] ss:$8 sps:$4 sm:$0xff]  }
  0x95   :  { %985 = vmatprep.subr.bf16.mxu0 %v1730_v60  ;;  %1596 = vmatpush3.bf16.msra.mxu1 %v1870_v32  ;;  %v1799_v60 = vld [vmem:[#allocation7 + $0x340] ss:$8 sps:$4 sm:$0xff]  }
  0x96   :  { %1597 = vmatprep.subr.bf16.mxu1 %v1871_v33  ;;  %v219_v33 = vlaneseq }
  0x98   :  { %986 = vmatpush1.bf16.msra.mxu0 %v1728_v63  ;;  %v1813_v63 = vld [vmem:[#allocation7 + $0x364] ss:$8 sps:$4 sm:$0xff]  }
  0x99   :  { %987 = vmatprep.subr.bf16.mxu0 %v1733_v0  ;;  %1598 = vmatpush3.bf16.msra.mxu1 %v1872_v36  ;;  %v1811_v0 = vld [vmem:[#allocation7 + $0x360] ss:$8 sps:$4 sm:$0xff]  }
  0x9a   :  { %1599 = vmatprep.subr.bf16.mxu1 %v1873_v37 }
  0x9c   :  { %988 = vmatpush1.bf16.msra.mxu0 %v1731_v3  ;;  %v1825_v3 = vld [vmem:[#allocation7 + $0x384] ss:$8 sps:$4 sm:$0xff]  }
  0x9d   :  { %989 = vmatprep.subr.bf16.mxu0 %v1736_v4  ;;  %1600 = vmatpush3.bf16.msra.mxu1 %v1874_v40  ;;  %v1823_v4 = vld [vmem:[#allocation7 + $0x380] ss:$8 sps:$4 sm:$0xff]  }
  0x9e   :  { %1601 = vmatprep.subr.bf16.mxu1 %v1875_v41 }
  0xa0   :  { %990 = vmatpush1.bf16.msra.mxu0 %v1734_v7  ;;  %v1837_v7 = vld [vmem:[#allocation7 + $0x3a4] ss:$8 sps:$4 sm:$0xff]  }
  0xa1   :  { %991 = vmatprep.subr.bf16.mxu0 %v1739_v8  ;;  %1602 = vmatpush3.bf16.msra.mxu1 %v1876_v44  ;;  %v1835_v8 = vld [vmem:[#allocation7 + $0x3a0] ss:$8 sps:$4 sm:$0xff]  }
  0xa2   :  { %1603 = vmatprep.subr.bf16.mxu1 %v1877_v20  ;;  %v1889_v20 = vld [vmem:[#allocation10 + $0x20] sm:$0xff]  }
  0xa4   :  { %992 = vmatpush1.bf16.msra.mxu0 %v1737_v13  ;;  %v1855_v13 = vld [vmem:[#allocation7 + $0x3d4] ss:$8 sps:$4 sm:$0xff]  }
  0xa5   :  { %993 = vmatprep.subr.bf16.mxu0 %v1742_v14  ;;  %v1853_v14 = vld [vmem:[#allocation7 + $0x3d0] ss:$8 sps:$4 sm:$0xff]  }
  0xa8   :  { %994 = vmatpush1.bf16.msra.mxu0 %v1740_v17  ;;  %v1866_v17 = vld [vmem:[#allocation7 + $0x3f4] ss:$8 sps:$4 sm:$0xff]  }
  0xa9   :  { %995 = vmatprep.subr.bf16.mxu0 %v1745_v18  ;;  %v1864_v18 = vld [vmem:[#allocation7 + $0x3f0] ss:$8 sps:$4 sm:$0xff]  }
  0xac   :  { %996 = vmatpush1.bf16.msra.mxu0 %v1743_v19  ;;  %v1430_v19 = vcombine.low %v2125_v50, %v2125_v50 }
  0xad   :  { %997 = vmatprep.subr.bf16.mxu0 %v1748_v21  ;;  %v1878_v21 = vld [vmem:[#allocation9 + $0x20] sm:$0xff]  }
  0xae   :  { %1604 = vmatpush3.bf16.msra.mxu1 %v1878_v21  ;;  %v1890_v21 = vld [vmem:[#allocation10 + $0x28] sm:$0xff]  }
  0xaf   :  { %1605 = vmatprep.subr.bf16.mxu1 %v1879_v22  ;;  %v1891_v22 = vld [vmem:[#allocation10 + $0x30] sm:$0xff]  }
  0xb0   :  { %998 = vmatpush1.bf16.msra.mxu0 %v1746_v25  ;;  %v1882_v25 = vld [vmem:[#allocation9 + $0x30] sm:$0xff]  }
  0xb1   :  { %999 = vmatprep.subr.bf16.mxu0 %v1751_v26  ;;  %v1883_v26 = vld [vmem:[#allocation9 + $0x78] sm:$0xff]  }
  0xb2   :  { %1606 = vmatpush3.bf16.msra.mxu1 %v1880_v23  ;;  %v1892_v23 = vld [vmem:[#allocation10 + $0x38] sm:$0xff]  }
  0xb3   :  { %1607 = vmatprep.subr.bf16.mxu1 %v1881_v24  ;;  %v1280_v24 = vstv %s1279_s14 }
  0xb4   :  { %1000 = vmatpush1.bf16.msra.mxu0 %v1749_v29 }
  0xb5   :  { %1001 = vmatprep.subr.bf16.mxu0 %v1754_v30 }
  0xb6   :  { %1608 = vmatpush3.bf16.msra.mxu1 %v1882_v25 }
  0xb7   :  { %1609 = vmatprep.subr.bf16.mxu1 %v1883_v26 }
  0xb8   :  { %1002 = vmatpush1.bf16.msra.mxu0 %v1752_v34  ;;  %v1068_v34 = vand.u32 127, %v219_v33 }
  0xb9   :  { %1003 = vmatprep.subr.bf16.mxu0 %v1757_v35  ;;  %v220_v35 = vshrl.u32 %v219_v33, 7 }
  0xba   :  { %1610 = vmatpush3.bf16.msra.mxu1 %v1884_v27  ;;  %v1069_v36 = vadd.s32 128, %v1068_v34 }
  0xbb   :  { %1626 = vmatprep.subr.bf16.mxu1 %v2019_v28  ;;  %v1070_v37 = vmul.u32 2654435761, %v220_v35 }
  0xbc   :  { %1004 = vmatpush1.bf16.msra.mxu0 %v1755_v38  ;;  %v1072_v38 = vmul.u32 2246822519, %v1069_v36 }
  0xbd   :  { %1005 = vmatprep.subr.bf16.mxu0 %v1760_v39  ;;  %v1071_v39 = vmul.u32 2246822519, %v1068_v34 }
  0xbe   :  { %v1074_v40 = vxor.u32 %v1072_v38, %v1070_v37 }
  0xbf   :  { %v2137_v41 = vxor.u32 %v1071_v39, %v1070_v37 }
  0xc0   :  { %1006 = vmatpush1.bf16.msra.mxu0 %v1758_v42  ;;  %v1076_v42 = vstv %s1075_s10 }
  0xc1   :  { %1007 = vmatprep.subr.bf16.mxu0 %v1763_v43  ;;  %v1078_v43 = vxor.u32 %v1076_v42, %v1074_v40  ;;  %v1077_v44 = vxor.u32 %v1076_v42, %v2137_v41  ;;  %v1281_v25 = vxor.u32 %v1280_v24, %v2137_v41 }
  0xc3   :  { %v1282_v26 = vshrl.u32 %v1281_v25, 16 }
  0xc4   :  { %1008 = vmatpush1.bf16.msra.mxu0 %v1761_v45  ;;  %v1080_v45 = vshrl.u32 %v1078_v43, 16 }
  0xc5   :  { %1009 = vmatprep.subr.bf16.mxu0 %v1769_v47  ;;  %v1079_v47 = vshrl.u32 %v1077_v44, 16  ;;  %v1283_v27 = vxor.u32 %v1282_v26, %v1281_v25 }
  0xc8   :  { %1010 = vmatpush1.bf16.msra.mxu0 %v1767_v48  ;;  %v1082_v48 = vxor.u32 %v1080_v45, %v1078_v43 }
  0xc9   :  { %1020 = vmatprep.subr.bf16.mxu0 %v1777_v49  ;;  %v1081_v49 = vxor.u32 %v1079_v47, %v1077_v44  ;;  %v1583_v44 = vld [vmem:[%s2180_s7] ss:$0 sm:$0xff] }
  0xca   :  { %v1084_v50 = vmul.u32 2146121005, %v1082_v48 }
  0xcb   :  { %1012 = vmatmul.mubr.bf16.vlgmr.msra.gmra.mrb[0].mxu0 %v1428_v51  ;;  %v1083_v51 = vmul.u32 2146121005, %v1081_v49 }
  0xcc   :  { %1021 = vmatpush1.bf16.msra.mxu0 %v1775_v52  ;;  %1052 = vmatprep.mubr.bf16.mxu0 %v1431_v53  ;;  %v1086_v52 = vshrl.u32 %v1084_v50, 15 }
  0xcd   :  { %1022 = vmatprep.subr.bf16.mxu0 %v1783_v54  ;;  %v1085_v53 = vshrl.u32 %v1083_v51, 15 }
  0xce   :  { %v1088_v54 = vxor.u32 %v1086_v52, %v1084_v50 }
  0xd0   :  { %1023 = vmatpush1.bf16.msra.mxu0 %v1781_v55  ;;  %v221_v55 = vsub.s32 0, %v220_v35 }
  0xd1   :  { %1024 = vmatprep.subr.bf16.mxu0 %v1789_v56  ;;  %v1087_v56 = vxor.u32 %v1085_v53, %v1083_v51 }
  0xd4   :  { %1025 = vmatpush1.bf16.msra.mxu0 %v1787_v57  ;;  %v217_v57 = vld [vmem:[%s2176_s3] sm:$0x3] }
  0xd5   :  { %1026 = vmatprep.subr.bf16.mxu0 %v1795_v58  ;;  %v225_v58 = vsub.s32 1, %v220_v35  ;;  %v1560_v35 = vld [vmem:[%s2178_s5] ss:$0 sm:$0xff]  ;;  %s1981_s5 = scalar_lea.vmem %s1414_s18, 128 }
  0xd6   :  { %p1982_p4 = scmp.ne.s32.totalorder %s1414_s18, %s1981_s5  ;;  %p1987_p6 = scmp.lt.s32.totalorder %s1981_s5, %s1981_s5 }
  0xd8   :  { %1027 = vmatpush1.bf16.msra.mxu0 %v1793_v59  ;;  %v1090_v59 = vmul.u32 2221713035, %v1088_v54  ;;  %p1988_p7 = por %p1987_p6, %p1986_p5 }
  0xd9   :  { %1028 = vmatprep.subr.bf16.mxu0 %v1801_v46  ;;  %v222_v46 = vrot.slane %v217_v57, %v221_v55 }
  0xda   :  { %p1989_p8 = pnand %p1988_p7, %p1982_p4 }
  0xdc   :  { %1029 = vmatpush1.bf16.msra.mxu0 %v1799_v60  ;;  %v1089_v60 = vmul.u32 2221713035, %v1087_v56 }
  0xdd   :  { %1030 = vmatprep.subr.bf16.mxu0 %v1807_v61  ;;  %v226_v61 = vrot.slane %v217_v57, %v225_v58 }
  0xe0   :  { %1031 = vmatpush1.bf16.msra.mxu0 %v1805_v62  ;;  %v1092_v62 = vshrl.u32 %v1090_v59, 16 }
  0xe1   :  { %1032 = vmatprep.subr.bf16.mxu0 %v1813_v63 }
  0xe4   :  { %1033 = vmatpush1.bf16.msra.mxu0 %v1811_v0  ;;  %v1091_v0 = vshrl.u32 %v1089_v60, 16 }
  0xe5   :  { %1034 = vmatprep.subr.bf16.mxu0 %v1819_v1 }
  0xe8   :  { %1035 = vmatpush1.bf16.msra.mxu0 %v1817_v2 }
  0xe9   :  { %1036 = vmatprep.subr.bf16.mxu0 %v1825_v3  ;;  %v1094_v3 = vxor.u32 %v1092_v62, %v1090_v59 }
  0xeb   :  { %vm1096_vm0 = vcmp.ge.u32.totalorder %v1094_v3, 858993459 }
  0xec   :  { %1037 = vmatpush1.bf16.msra.mxu0 %v1823_v4  ;;  %vm1577_vm2 = vmpackc.low %vm1096_vm0, %vm1096_vm0 }
  0xed   :  { %1038 = vmatprep.subr.bf16.mxu0 %v1831_v5 }
  0xf0   :  { %1039 = vmatpush1.bf16.msra.mxu0 %v1829_v6  ;;  %v1093_v6 = vxor.u32 %v1091_v0, %v1089_v60 }
  0xf1   :  { %1040 = vmatprep.subr.bf16.mxu0 %v1837_v7 }
  0xf2   :  { %vm1095_vm1 = vcmp.ge.u32.totalorder %v1093_v6, 858993459 }
  0xf3   :  { %vm1580_vm3 = vmpackc.low %vm1095_vm1, %vm1095_vm1 }
  0xf4   :  { %1041 = vmatpush1.bf16.msra.mxu0 %v1835_v8 }
  0xf5   :  { %1042 = vmatprep.subr.bf16.mxu0 %v1843_v9 }
  0xf8   :  { %1043 = vmatpush1.bf16.msra.mxu0 %v1841_v10 }
  0xf9   :  { %1044 = vmatprep.subr.bf16.mxu0 %v1849_v11 }
  0xfc   :  { %1045 = vmatpush1.bf16.msra.mxu0 %v1847_v12 }
  0xfd   :  { %1046 = vmatprep.subr.bf16.mxu0 %v1855_v13 }
 0x100   :  { %1047 = vmatpush1.bf16.msra.mxu0 %v1853_v14 }
 0x101   :  { %1048 = vmatprep.subr.bf16.mxu0 %v1861_v15  ;;  %v1885_v15 = vld [vmem:[#allocation10] sm:$0xff]  }
 0x104   :  { %1049 = vmatpush1.bf16.msra.mxu0 %v1859_v16 }
 0x105   :  { %1050 = vmatprep.subr.bf16.mxu0 %v1866_v17  ;;  %v1886_v17 = vld [vmem:[#allocation10 + $0x8] sm:$0xff]  }
 0x108   :  { %1051 = vmatpush1.bf16.msra.mxu0 %v1864_v18  ;;  %v1887_v18 = vld [vmem:[#allocation10 + $0x10] sm:$0xff]  }
 0x10b   :  { %1053 = vmatmul.mubr.bf16.vlgmr.msra.gmra.mrb[0].mxu0 %v1430_v19  ;;  %v1888_v19 = vld [vmem:[#allocation10 + $0x18] sm:$0xff]  }
 0x167   :  { %v931_v29 = vpop.f32.mrb[0].mxu1 }
 0x168   :  { %v933_v30 = vpop.f32.mrb[1].mxu1  ;;  %v932_v63 = vadd.f32 %v931_v29, %v222_v46  ;;  %v1284_v29 = vmul.u32 2146121005, %v1283_v27 }
 0x169   :  { %v935_v31 = vpop.f32.mrb[2].mxu1  ;;  %v934_v1 = vadd.f32 %v933_v30, %v226_v61 }
 0x16a   :  { %v936_v32 = vpop.f32.mrb[3].mxu1  ;;  %v1285_v30 = vshrl.u32 %v1284_v29, 15 }
 0x16c   :  { %v1286_v31 = vxor.u32 %v1285_v30, %v1284_v29 }
 0x16e   :  { %v1287_v32 = vmul.u32 2221713035, %v1286_v31 }
 0x170   :  { %v1288_v33 = vshrl.u32 %v1287_v32, 16 }
 0x172   :  { %v1289_v38 = vxor.u32 %v1288_v33, %v1287_v32 }
 0x174   :  { %vm1290_vm5 = vcmp.ge.u32.totalorder %v1289_v38, 2147483648 }
 0x175   :  { %vm1592_vm6 = vmpackc.low %vm1290_vm5, %vm1290_vm5 }
 0x1de   :  { %v1054_v2 = vpop.f32.mrb[0].mxu0 }
 0x1df   :  { %v1647_v4 = vadd.f32 %v1054_v2, %v932_v63  ;;  %v1056_v5 = vpop.f32.mrb[1].mxu0 }
 0x1e0   :  { %v1649_v7 = vadd.f32 %v1056_v5, %v934_v1  ;;  %v1058_v8 = vpop.f32.mrb[2].mxu0 }
 0x1e1   :  { %v1061_v9 = vmax.f32 %v1647_v4, 0.0  ;;  %v1059_v10 = vpop.f32.mrb[3].mxu0 }
 0x1e2   :  { %v1062_v11 = vmax.f32 %v1649_v7, 0.0 }
 0x1e3   :  { %v1097_v12 = vmul.f32 1.25, %v1061_v9 }
 0x1e4   :  { %v1098_v13 = vmul.f32 1.25, %v1062_v11 }
 0x1e5   :  { %v1581_v16 = vpack.c.bf16 %v1097_v12, %v1097_v12 }
 0x1e6   :  { %v1578_v14 = vpack.c.bf16 %v1098_v13, %v1098_v13 }
 0x1e8   :  { %1579 = vmatprep.mubr.msk.bf16.mxu1 %vm1577_vm2, %v1578_v14 }
 0x1e9   :  { %1582 = vmatmul.mubr.msk.bf16.vlgmr.msra.gmra.mrb[4].mxu1 %vm1580_vm3, %v1581_v16 }
 0x1ea   :  { %1627 = vmatpush3.bf16.msra.mxu1 %v1885_v15  ;;  %1642 = vmatprep.mubr.msk.bf16.mxu1 %vm2020_vm4, %v2019_v28 }
 0x1eb   :  { %1628 = vmatprep.subr.bf16.mxu1 %v2019_v28 }
 0x1ee   :  { %1629 = vmatpush3.bf16.msra.mxu1 %v1886_v17 }
 0x1ef   :  { %1630 = vmatprep.subr.bf16.mxu1 %v2019_v28 }
 0x1f2   :  { %1631 = vmatpush3.bf16.msra.mxu1 %v1887_v18 }
 0x1f3   :  { %1632 = vmatprep.subr.bf16.mxu1 %v2019_v28 }
 0x1f6   :  { %1633 = vmatpush3.bf16.msra.mxu1 %v1888_v19 }
 0x1f7   :  { %1634 = vmatprep.subr.bf16.mxu1 %v2019_v28 }
 0x1fa   :  { %1635 = vmatpush3.bf16.msra.mxu1 %v1889_v20 }
 0x1fb   :  { %1636 = vmatprep.subr.bf16.mxu1 %v2019_v28 }
 0x1fe   :  { %1637 = vmatpush3.bf16.msra.mxu1 %v1890_v21 }
 0x1ff   :  { %1638 = vmatprep.subr.bf16.mxu1 %v2019_v28 }
 0x202   :  { %1639 = vmatpush3.bf16.msra.mxu1 %v1891_v22 }
 0x203   :  { %1640 = vmatprep.subr.bf16.mxu1 %v2019_v28 }
 0x206   :  { %1641 = vmatpush3.bf16.msra.mxu1 %v1892_v23 }
 0x2bc   :  { %v1611_v34 = vpop.f32.mrb[4].mxu1 }
 0x2bd   :  { %v1612_v28 = vpop.f32.mrb[5].mxu1 }
 0x2be   :  { %v1613_v36 = vadd.f32 %v1612_v28, %v1611_v34  ;;  %v1614_v37 = vpop.f32.mrb[6].mxu1 }
 0x2bf   :  { %v1615_v39 = vpop.f32.mrb[7].mxu1 }
 0x2c0   :  { %v1273_v40 = vadd.f32 %v1613_v36, %v1560_v35 }
 0x2c2   :  { %v1278_v42 = vmax.f32 %v1273_v40, 0.0 }
 0x2c4   :  { %v1291_v41 = vmul.f32 2.0, %v1278_v42 }
 0x2c6   :  { %v1593_v43 = vpack.c.bf16 %v1291_v41, %v1291_v41 }
 0x2c8   :  { %1643 = vmatmul.mubr.msk.bf16.vlgmr.msra.gmra.mrb[8].mxu1 %vm1592_vm6, %v1593_v43 }
 0x39b   :  { %v1399_v45 = vpop.f32.mrb[8].mxu1 }
 0x39c   :  { %v1400_v47 = vadd.f32 %v1583_v44, %v1399_v45  ;;  %v1644_v48 = vpop.f32.mrb[9].mxu1 }
 0x39d   :  { %v1402_v49 = vpop.f32.mrb[10].mxu1 }
 0x39e   :  { %v1405_v50 = vmax.f32 %v1400_v47, 0.0  ;;  %v1645_v51 = vpop.f32.mrb[11].mxu1 }
 0x3a0   :  { %1406 = vst [vmem:[#allocation12] sm:$0xff] %v1405_v50 }
 0x3a1   :  { %1992 = shalt.err (!%p1989_p8)
}
 0x3a2   :  { %s1993_s7 = scalar_lea.hbm %s2181_s8, 128 }
 0x3a3   :  { %p1994_p9 = scmp.ne.s32.totalorder %s2181_s8, %s1993_s7  ;;  %p1997_p10 = scmp.lt.u32.totalorder %s1993_s7, %s2181_s8 }
 0x3a5   :  { %p1999_p11 = pnand %p1997_p10, %p1994_p9 }
 0x3a7   :  { %2002 = shalt.err (!%p1999_p11)
}
 0x3a8   :  { %1416 = dma.vmem_to_hbm [thread:$0]  %s1414_s18, 128, %s2181_s8, [#allocation6]  }
 0x3a9   :  { %2009 = dma.done.wait [#allocation6], 128  }
 0x3aa   :  { %2010 = vsyncadd [#allocation6], 4294967168 }
 0x3ab   :  { %1420 = vsyncpa [#allocation5], 1 }
 0x3ac   :  { %1421 = vsyncpa [#allocation8], 1 }
 0x3ad   :  { %1422 = vsyncpa [#allocation11], 1 }
 0x3ae   :  { %1423 = vsyncpa [#allocation6], 1 }

</bundles_post_ra>
